<compile_context>
chip_gen: v7x
topology: tpu7x:2x2x1
jax: 0.10.0
libtpu: 0.0.40
codegen_flags: <defaults>
</compile_context>

<pallas_src>
import functools

import jax
import jax.numpy as jnp
import numpy as np
from jax.experimental import pallas as pl
from jax.experimental.pallas import tpu as pltpu


def _priority_kernel(s_ref, w_ref, b_ref, o_ref):
    # s_ref: (TR, CLP)  w_ref: (CLP, CLP)  b_ref: (1, CLP)  o_ref: (TR, CLP)
    acc = jnp.dot(s_ref[...], w_ref[...], preferred_element_type=jnp.float32)
    o_ref[...] = (acc + b_ref[...]).astype(o_ref.dtype)


def _round_up(x, m):
    return ((x + m - 1) // m) * m


@functools.cache
def _tpu_generation():
    """Best-effort TPU generation (7 for v7x, 6 for v6e, 5 for v5e, 0 unknown)."""
    try:
        kind = jax.devices()[0].device_kind.lower()
    except Exception:
        return 0
    for g in (7, 6, 5, 4, 3, 2):
        if str(g) in kind:
            return g
    return 0


@jax.jit
def priority_layer(scores, priority_mat, priority_bias):
    """scores: (B, L, C) or (B, C); priority_mat: (C, C); priority_bias: (C,)."""
    orig_shape = scores.shape
    C = orig_shape[-1]
    out_dtype = scores.dtype
    itemsize = jnp.dtype(out_dtype).itemsize
    sub = max(8, 32 // itemsize)            # sublane tile: 8 f32 / 16 bf16 / 32 int8

    scores_2d = scores.reshape(-1, C)
    M = scores_2d.shape[0]

    # Lane folding factor and folded / lane-padded widths.
    F = max(1, 128 // C) if C < 128 else 1
    CL = F * C                               # folded lane width (may be < 128)
    CLP = _round_up(CL, 128)                 # lane-dense width used by the kernel
    r_raw = -(-M // F)                       # ceil(M / F): folded row count

    # Fallbacks: tiny problems (pallas_call overhead dominates) and very large
    # C (double-buffered (CLP, CLP) weight would crowd VMEM, esp. v7x 64 MiB).
    # TODO(synk): tile the K/N dims of the weight instead of falling back for very large C.
    if r_raw < sub or 2 * CLP * CLP * itemsize > (16 << 20):
        acc = jnp.dot(scores_2d, priority_mat.astype(out_dtype),
                      preferred_element_type=jnp.float32)
        out = (acc + priority_bias.astype(jnp.float32)).astype(out_dtype)
        return out.reshape(orig_shape)

    # ---- generation-aware block policy -------------------------------------
    gen = _tpu_generation()
    if gen >= 7:      # ~3.2 TB/s HBM, 64 MiB VMEM/TC, 2 TCs share the grid
        blk_target, blk_min_bytes, tr_cap, want_steps = 4 << 20, 1 << 20, 16384, 8
    elif gen == 6:    # ~1.4 TB/s HBM, 128 MiB VMEM, 1 TC
        blk_target, blk_min_bytes, tr_cap, want_steps = 4 << 20, 1 << 19, 16384, 1
    else:             # v5e & older / unknown: ~0.8 TB/s, keep modest tiles
        blk_target, blk_min_bytes, tr_cap, want_steps = 1 << 20, 1 << 18, 4096, 1

    vmem_budget = 32 << 20
    # Leave room for the double-buffered weight/bias and 2x(in)+2x(out) blocks.
    w_bytes = 2 * (CLP * CLP * itemsize + CLP * 4)
    blk_target = min(blk_target, max(blk_min_bytes, (vmem_budget - w_bytes) // 5))

    row_bytes = CLP * itemsize
    tr = max(sub, min(tr_cap, (blk_target // row_bytes) // sub * sub))

    # Pad only to the fold * sublane granularity (<= F*sub - 1 rows).
    r_pad = _round_up(r_raw, sub)

    # v7x: cap the tile so large problems split into >= ~want_steps grid steps
    # (both TensorCores participate), but never below ~blk_min_bytes blocks.
    if want_steps > 1:
        rows_min = max(sub, (blk_min_bytes // row_bytes) // sub * sub)
        want = _round_up(-(-r_pad // want_steps), sub)
        tr = max(rows_min, min(tr, want))

    tr = min(tr, r_pad)                      # block never exceeds the array
    m_pad = r_pad * F
    pad_rows = m_pad - M

    # NOTE: a ragged M (pad_rows > 0) pays one extra pad pass over the input
    # and one slice pass over the output; M % (F*sub) == 0 is the fast path.
    s = jnp.pad(scores_2d, ((0, pad_rows), (0, 0))) if pad_rows else scores_2d
    s_fold = s.reshape(r_pad, CL)
    if CLP != CL:
        s_fold = jnp.pad(s_fold, ((0, 0), (0, CLP - CL)))

    # Weight / bias: weight in activation dtype (bf16 MXU path for bf16
    # scores), bias kept in f32 (added to the f32 accumulator).
    w = priority_mat.astype(out_dtype)
    b = priority_bias.astype(jnp.float32)
    if F > 1:
        w = jnp.kron(jnp.eye(F, dtype=w.dtype), w)     # (CL, CL) block-diagonal
        b = jnp.tile(b, F)
    if CLP != CL:
        w = jnp.pad(w, ((0, CLP - CL), (0, CLP - CL)))
        b = jnp.pad(b, (0, CLP - CL))
    b = b.reshape(1, CLP)

    grid = (pl.cdiv(r_pad, tr),)             # ceil-div; last block masked by Pallas
    cost = pl.CostEstimate(
        flops=2 * r_pad * CLP * CLP,
        transcendentals=0,
        bytes_accessed=2 * r_pad * CLP * itemsize + CLP * CLP * itemsize + CLP * 4,
    )

    out_fold = pl.pallas_call(
        _priority_kernel,
        out_shape=jax.ShapeDtypeStruct((r_pad, CLP), out_dtype),
        grid=grid,
        in_specs=[
            pl.BlockSpec((tr, CLP), lambda i: (i, 0)),    # activations: tiled over M
            pl.BlockSpec((CLP, CLP), lambda i: (0, 0)),   # weight: VMEM-resident
            pl.BlockSpec((1, CLP), lambda i: (0, 0)),     # bias: VMEM-resident
        ],
        out_specs=pl.BlockSpec((tr, CLP), lambda i: (i, 0)),
        compiler_params=pltpu.CompilerParams(
            dimension_semantics=("parallel",),            # shards M-tiles across TCs (v7x)
            vmem_limit_bytes=vmem_budget,
        ),
        cost_estimate=cost,
    )(s_fold, w, b)

    out = out_fold
    if CLP != CL:
        out = out[:, :CL]
    out = out.reshape(m_pad, C)
    if pad_rows:
        out = out[:M]
    return out.reshape(orig_shape)


def make_priority_params(C, origin_C=None, seed=0):
    """Deterministic parameter init mirroring PriorityLayer.__init__."""
    base = np.eye(C, dtype=np.float32)
    if origin_C is not None:
        rng = np.random.RandomState(seed)
        origin = rng.uniform(-0.5, 0.5, size=(origin_C, origin_C)).astype(np.float32)
        base[:origin_C, :origin_C] = origin
    return jnp.asarray(base), jnp.zeros((C,), dtype=jnp.float32)


if __name__ == "__main__":
    key = jax.random.PRNGKey(0)
    k1, k2, k3, k4 = jax.random.split(key, 4)

    def ref_fn(s, mat, bias):
        if s.ndim > 2:
            return jnp.einsum("blc,cd->bld", s.astype(jnp.float32), mat) + bias
        return jnp.einsum("bc,cd->bd", s.astype(jnp.float32), mat) + bias

    # ---- C = 32 (folded lane-dense path) ------------------------------------
    C = 32
    pmat, pbias = make_priority_params(C, origin_C=16, seed=0)

    # 1) Ragged M (exercises fold/sublane padding): B=2, L=130 -> M=260.
    scores = jax.random.normal(k1, (2, 130, C), dtype=jnp.float32)
    out = jax.block_until_ready(priority_layer(scores, pmat, pbias))
    assert out.dtype == scores.dtype
    np.testing.assert_allclose(np.asarray(out), np.asarray(ref_fn(scores, pmat, pbias)),
                               rtol=1e-5, atol=1e-5)

    # 2) Multi-block grid with masked ragged last block: M = 32800 folded rows 8200.
    scores_big = jax.random.normal(k2, (2, 16400, C), dtype=jnp.float32)
    out_big = jax.block_until_ready(priority_layer(scores_big, pmat, pbias))
    np.testing.assert_allclose(np.asarray(out_big),
                               np.asarray(ref_fn(scores_big, pmat, pbias)),
                               rtol=1e-4, atol=1e-4)

    # 3) bf16 inputs: dtype preserved, f32 accumulation inside the kernel.
    scores_bf = jax.random.normal(k3, (2, 256, C), dtype=jnp.float32).astype(jnp.bfloat16)
    out_bf = jax.block_until_ready(priority_layer(scores_bf, pmat, pbias))
    assert out_bf.dtype == jnp.bfloat16
    np.testing.assert_allclose(np.asarray(out_bf, dtype=np.float32),
                               np.asarray(ref_fn(scores_bf, pmat, pbias)),
                               rtol=2e-2, atol=2e-2)

    # 4) C = 48 (128 % C != 0): lane-padded fold path (F=2, CL=96 -> CLP=128).
    C2 = 48
    pmat2, pbias2 = make_priority_params(C2, origin_C=16, seed=1)
    scores_48 = jax.random.normal(k4, (2, 64, C2), dtype=jnp.float32)
    out_48 = jax.block_until_ready(priority_layer(scores_48, pmat2, pbias2))
    np.testing.assert_allclose(np.asarray(out_48),
                               np.asarray(ref_fn(scores_48, pmat2, pbias2)),
                               rtol=1e-5, atol=1e-5)

    # 5) Tiny 3-D and 2-D inputs take the small-M fallback (same semantics).
    scores_small = scores[:, :8, :]
    out_small = jax.block_until_ready(priority_layer(scores_small, pmat, pbias))
    np.testing.assert_allclose(np.asarray(out_small),
                               np.asarray(ref_fn(scores_small, pmat, pbias)),
                               rtol=1e-5, atol=1e-5)
    scores_2d = scores[:, 0, :]
    out_2d = jax.block_until_ready(priority_layer(scores_2d, pmat, pbias))
    np.testing.assert_allclose(np.asarray(out_2d),
                               np.asarray(ref_fn(scores_2d, pmat, pbias)),
                               rtol=1e-5, atol=1e-5)

    print("KERNEL_OK")
</pallas_src>

<mosaic_0001>
module attributes {stable_mosaic.version = 11 : i64} {
  func.func @_priority_kernel(%arg0: i32, %arg1: memref<72x128xf32, #tpu.memory_space<vmem>>, %arg2: memref<128x128xf32, #tpu.memory_space<vmem>>, %arg3: memref<1x128xf32, #tpu.memory_space<vmem>>, %arg4: memref<72x128xf32, #tpu.memory_space<vmem>>) attributes {dimension_semantics = [#tpu.dimension_semantics<parallel>], iteration_bounds = array<i64: 1>, scalar_prefetch = 0 : i64, scratch_operands = 0 : i64, tpu.core_type = #tpu.core_type<tc>, window_params = [{transform_indices = @transform_0, window_bounds = array<i64: 72, 128>}, {pipeline_mode = #tpu.pipeline_mode<synchronous>, transform_indices = @transform_1, window_bounds = array<i64: 128, 128>}, {pipeline_mode = #tpu.pipeline_mode<synchronous>, transform_indices = @transform_2, window_bounds = array<i64: 1, 128>}, {transform_indices = @transform_3, window_bounds = array<i64: 72, 128>}]} {
    %c0 = arith.constant 0 : index
    %c0_0 = arith.constant 0 : index
    %0 = vector.load %arg1[%c0, %c0_0] : memref<72x128xf32, #tpu.memory_space<vmem>>, vector<72x128xf32>
    %c0_1 = arith.constant 0 : index
    %c0_2 = arith.constant 0 : index
    %1 = vector.load %arg2[%c0_1, %c0_2] : memref<128x128xf32, #tpu.memory_space<vmem>>, vector<128x128xf32>
    %cst = arith.constant dense<0.000000e+00> : vector<72x128xf32>
    %2 = tpu.matmul %0, %1, %cst {dimension_numbers = #tpu.dot_dimension_numbers<[1], [0], [0], [1], [0, 0, 1, 1], [], []>} : vector<72x128xf32>, vector<128x128xf32>, vector<72x128xf32> -> vector<72x128xf32>
    %c0_3 = arith.constant 0 : index
    %c0_4 = arith.constant 0 : index
    %3 = vector.load %arg3[%c0_3, %c0_4] : memref<1x128xf32, #tpu.memory_space<vmem>>, vector<1x128xf32>
    %4 = vector.broadcast %3 : vector<1x128xf32> to vector<72x128xf32>
    %5 = arith.addf %2, %4 : vector<72x128xf32>
    %c0_5 = arith.constant 0 : index
    %c0_6 = arith.constant 0 : index
    %6 = vector.load %arg4[%c0_5, %c0_6] : memref<72x128xf32, #tpu.memory_space<vmem>>, vector<72x128xf32>
    tpu.vector_store %arg4[%c0_5, %c0_6], %5 {strides = array<i32>} : memref<72x128xf32, #tpu.memory_space<vmem>>, vector<72x128xf32>,
    return
  }
  func.func @transform_0(%arg0: i32) -> (i32, i32) {
    %c0_i32 = arith.constant 0 : i32
    %c0_i32_0 = arith.constant 0 : i32
    return %arg0, %c0_i32 : i32, i32
  }
  func.func @transform_1(%arg0: i32) -> (i32, i32) {
    %c0_i32 = arith.constant 0 : i32
    %c0_i32_0 = arith.constant 0 : i32
    %c0_i32_1 = arith.constant 0 : i32
    return %c0_i32, %c0_i32_0 : i32, i32
  }
  func.func @transform_2(%arg0: i32) -> (i32, i32) {
    %c0_i32 = arith.constant 0 : i32
    %c0_i32_0 = arith.constant 0 : i32
    %c0_i32_1 = arith.constant 0 : i32
    return %c0_i32, %c0_i32_0 : i32, i32
  }
  func.func @transform_3(%arg0: i32) -> (i32, i32) {
    %c0_i32 = arith.constant 0 : i32
    %c0_i32_0 = arith.constant 0 : i32
    return %arg0, %c0_i32 : i32, i32
  }
}

</mosaic_0001>

<bundles_post_ra>
// kernel: tile.8
= control target key start
LH: loop header
LB: loop body
LE: loop exit
PB: predicated region body
PF: predicated region fallthrough
CT: control target
= control target key end

     0   :  { %s22_s0 = inlined_call_operand.vmem [shape: f32[32], index: 0, kind: input, shape index: {}]   ;;  %s23_s1 = inlined_call_operand.vmem [shape: f32[4,32], index: 1, kind: output, shape index: {}]  }
   0x1   :  { %v4_v0 = vld [vmem:[%s22_s0] ss:$0 sm:$0xff] }
   0x2   :  { %5 = vst [vmem:[%s23_s1] sm:$0xf] %v4_v0 }

// kernel: tile.9
= control target key start
LH: loop header
LB: loop body
LE: loop exit
PB: predicated region body
PF: predicated region fallthrough
CT: control target
= control target key end

     0   :  { %vm7_vm0 = vcmask 261120   ;;  %s37_s8 = smov 32   ;;  %s38_s9 = smov 64   ;;  %vm13_vm1 = vcmask 1048320   ;;  %vm19_vm2 = vcmask 785920   ;;  %vm25_vm3 = vcmask 523520   ;;  %s55_s0 = inlined_call_operand.vmem [shape: f32[4,32], index: 0, kind: input, shape index: {}]   ;;  %s56_s1 = inlined_call_operand.vmem [shape: f32[1,128], index: 1, kind: output, shape index: {}]  }
   0x1   :  { %v4_v0 = vld [vmem:[%s55_s0] sm:$0xf]  ;;  %s36_s0 = smov 96  }
   0x2   :  { %5 = vst [vmem:[#allocation1] sm:$0xf] %v4_v0 }
   0x9   :  { %v10_v1 = vld [vmem:[#allocation1 + $0x3] sm:$0x1]   ;;  %v22_v2 = vld [vmem:[#allocation1 + $0x1] sm:$0x1]   ;;  %v6_v3 = vld [vmem:[#allocation1] sm:$0x1]  }
   0xa   :  { %11 = vrot.lane.b32.xlu0 %v10_v1, %s36_s0  ;;  %23 = vrot.lane.b32.xlu1 %v22_v2, %s37_s8  ;;  %v16_v4 = vld [vmem:[#allocation1 + $0x2] sm:$0x1]   ;;  %8 = vst.msk [vmem:[#allocation0] sm:$0x1] %vm7_vm0, %v6_v3  }
   0xe   :  { %17 = vrot.lane.b32.xlu0 %v16_v4, %s38_s9 }
  0x7c   :  { %v12_v5 = vpop.permute.xlu0 %11   ;;  %v24_v6 = vpop.permute.xlu1 %23  }
  0x7d   :  { %14 = vst.msk [vmem:[#allocation0] sm:$0x1] %vm13_vm1, %v12_v5  }
  0x80   :  { %v18_v7 = vpop.permute.xlu0 %17  }
  0x81   :  { %20 = vst.msk [vmem:[#allocation0] sm:$0x1] %vm19_vm2, %v18_v7  }
  0x82   :  { %26 = vst.msk [vmem:[#allocation0] sm:$0x1] %vm25_vm3, %v24_v6  }
  0x89   :  { %v30_v8 = vld [vmem:[#allocation0] sm:$0x1] }
  0x8a   :  { %32 = vst [vmem:[%s56_s1] sm:$0x1] %v30_v8 }

// kernel: priority_layer.1
= control target key start
LH: loop header
LB: loop body
LE: loop exit
PB: predicated region body
PF: predicated region fallthrough
CT: control target
= control target key end

     0   :  { %v297_v0 = vmov 0.0|0.0   ;;  %vm298_vm0 = vmmov 0   ;;  %v299_v6 = vmov 0.0   ;;  %s443_s1 = inlined_call_operand.vmem [shape: f32[128,128], index: 1, kind: input, shape index: {}]   ;;  %s444_s0 = inlined_call_operand.vmem [shape: f32[72,128], index: 0, kind: input, shape index: {}]   ;;  %s445_s2 = inlined_call_operand.vmem [shape: f32[1,128], index: 2, kind: input, shape index: {}]   ;;  %s446_s3 = inlined_call_operand.vmem [shape: f32[72,128], index: 3, kind: output, shape index: {}]  }
   0x1   :  { %254 = vmatprep.subr.bf16.mxu0 %v297_v0  ;;  %v23_v1 = vld [vmem:[%s443_s1] sm:$0xff]  ;;  %v24_v2 = vld [vmem:[%s443_s1 + $0x8] sm:$0xff]  ;;  %278 = vmatprep.subr.bf16.mxu1 %v297_v0  ;;  %v25_v3 = vld [vmem:[%s443_s1 + $0x10] sm:$0xff] }
   0x2   :  { %v255_v4 = vpack.c.bf16 %v24_v2, %v23_v1  ;;  %v26_v5 = vld [vmem:[%s443_s1 + $0x18] sm:$0xff]  ;;  %227 = vmatprep.mubr.msk.f32.mxu0 %vm298_vm0, %v299_v6  ;;  %242 = vmatprep.mubr.msk.f32.mxu1 %vm298_vm0, %v299_v6  ;;  %v27_v8 = vld [vmem:[%s443_s1 + $0x20] sm:$0xff]  ;;  %v28_v9 = vld [vmem:[%s443_s1 + $0x28] sm:$0xff] }
   0x3   :  { %v258_v7 = vpack.c.bf16 %v26_v5, %v25_v3  ;;  %v261_v10 = vpack.c.bf16 %v28_v9, %v27_v8  ;;  %v29_v11 = vld [vmem:[%s443_s1 + $0x30] sm:$0xff]  ;;  %v30_v12 = vld [vmem:[%s443_s1 + $0x38] sm:$0xff]  ;;  %v31_v14 = vld [vmem:[%s443_s1 + $0x40] sm:$0xff] }
   0x4   :  { %256 = vmatpush3.bf16.msra.mxu0 %v255_v4  ;;  %286 = vmatpush3.bf16.msra.mxu1 %v255_v4  ;;  %v264_v13 = vpack.c.bf16 %v30_v12, %v29_v11  ;;  %v32_v15 = vld [vmem:[%s443_s1 + $0x48] sm:$0xff]  ;;  %v33_v17 = vld [vmem:[%s443_s1 + $0x50] sm:$0xff]  ;;  %v34_v18 = vld [vmem:[%s443_s1 + $0x58] sm:$0xff] }
   0x5   :  { %257 = vmatprep.subr.bf16.mxu0 %v297_v0  ;;  %279 = vmatprep.subr.bf16.mxu1 %v297_v0  ;;  %v267_v16 = vpack.c.bf16 %v32_v15, %v31_v14  ;;  %v270_v19 = vpack.c.bf16 %v34_v18, %v33_v17  ;;  %v35_v20 = vld [vmem:[%s443_s1 + $0x60] sm:$0xff]  ;;  %v36_v21 = vld [vmem:[%s443_s1 + $0x68] sm:$0xff]  ;;  %v37_v23 = vld [vmem:[%s443_s1 + $0x70] sm:$0xff] }
   0x6   :  { %v273_v22 = vpack.c.bf16 %v36_v21, %v35_v20  ;;  %v38_v24 = vld [vmem:[%s443_s1 + $0x78] sm:$0xff]  ;;  %v14_v26 = vld [vmem:[%s444_s0] sm:$0xff]  ;;  %v19_v27 = vld [vmem:[%s444_s0 + $0x28] sm:$0xff] }
   0x7   :  { %v276_v25 = vpack.c.bf16 %v38_v24, %v37_v23  ;;  %v15_v28 = vld [vmem:[%s444_s0 + $0x8] sm:$0xff]  ;;  %v20_v29 = vld [vmem:[%s444_s0 + $0x30] sm:$0xff]  ;;  %v21_v31 = vld [vmem:[%s444_s0 + $0x38] sm:$0xff] }
   0x8   :  { %259 = vmatpush3.bf16.msra.mxu0 %v258_v7  ;;  %287 = vmatpush3.bf16.msra.mxu1 %v258_v7  ;;  %v16_v30 = vld [vmem:[%s444_s0 + $0x10] sm:$0xff]  ;;  %v17_v32 = vld [vmem:[%s444_s0 + $0x18] sm:$0xff]  ;;  %v22_v33 = vld [vmem:[%s444_s0 + $0x40] sm:$0xff] }
   0x9   :  { %260 = vmatprep.subr.bf16.mxu0 %v297_v0  ;;  %280 = vmatprep.subr.bf16.mxu1 %v297_v0  ;;  %v18_v34 = vld [vmem:[%s444_s0 + $0x20] sm:$0xff] }
   0xa   :  { %v169_v35 = vld [vmem:[%s445_s2] ss:$0 sm:$0xff] }
   0xc   :  { %262 = vmatpush3.bf16.msra.mxu0 %v261_v10  ;;  %288 = vmatpush3.bf16.msra.mxu1 %v261_v10 }
   0xd   :  { %263 = vmatprep.subr.bf16.mxu0 %v297_v0  ;;  %281 = vmatprep.subr.bf16.mxu1 %v297_v0 }
  0x10   :  { %265 = vmatpush3.bf16.msra.mxu0 %v264_v13  ;;  %289 = vmatpush3.bf16.msra.mxu1 %v264_v13 }
  0x11   :  { %266 = vmatprep.subr.bf16.mxu0 %v297_v0  ;;  %282 = vmatprep.subr.bf16.mxu1 %v297_v0 }
  0x14   :  { %268 = vmatpush3.bf16.msra.mxu0 %v267_v16  ;;  %290 = vmatpush3.bf16.msra.mxu1 %v267_v16 }
  0x15   :  { %269 = vmatprep.subr.bf16.mxu0 %v297_v0  ;;  %283 = vmatprep.subr.bf16.mxu1 %v297_v0 }
  0x18   :  { %271 = vmatpush3.bf16.msra.mxu0 %v270_v19  ;;  %291 = vmatpush3.bf16.msra.mxu1 %v270_v19 }
  0x19   :  { %272 = vmatprep.subr.bf16.mxu0 %v297_v0  ;;  %284 = vmatprep.subr.bf16.mxu1 %v297_v0 }
  0x1c   :  { %274 = vmatpush3.bf16.msra.mxu0 %v273_v22  ;;  %292 = vmatpush3.bf16.msra.mxu1 %v273_v22 }
  0x1d   :  { %275 = vmatprep.subr.bf16.mxu0 %v297_v0  ;;  %285 = vmatprep.subr.bf16.mxu1 %v297_v0 }
  0x20   :  { %277 = vmatpush3.bf16.msra.mxu0 %v276_v25  ;;  %293 = vmatpush3.bf16.msra.mxu1 %v276_v25 }
  0x23   :  { %228 = vmatmul.mubr.f32.vlgmr.msra.gmra.mrb[0].mxu0 %v14_v26  ;;  %243 = vmatmul.mubr.f32.vlgmr.msra.gmra.mrb[0].mxu1 %v19_v27 }
  0x24   :  { %230 = vmatprep.mubr.msk.f32.mxu0 %vm298_vm0, %v299_v6  ;;  %245 = vmatprep.mubr.msk.f32.mxu1 %vm298_vm0, %v299_v6 }
  0x27   :  { %231 = vmatmul.mubr.f32.gmra.mrb[2].mxu0 %v15_v28  ;;  %246 = vmatmul.mubr.f32.gmra.mrb[2].mxu1 %v20_v29 }
  0x28   :  { %233 = vmatprep.mubr.msk.f32.mxu0 %vm298_vm0, %v299_v6  ;;  %248 = vmatprep.mubr.msk.f32.mxu1 %vm298_vm0, %v299_v6 }
  0x2b   :  { %234 = vmatmul.mubr.f32.gmra.mrb[4].mxu0 %v16_v30  ;;  %249 = vmatmul.mubr.f32.gmra.mrb[4].mxu1 %v21_v31 }
  0x2c   :  { %236 = vmatprep.mubr.msk.f32.mxu0 %vm298_vm0, %v299_v6  ;;  %251 = vmatprep.mubr.msk.f32.mxu1 %vm298_vm0, %v299_v6 }
  0x2f   :  { %237 = vmatmul.mubr.f32.gmra.mrb[6].mxu0 %v17_v32  ;;  %252 = vmatmul.mubr.f32.gmra.mrb[6].mxu1 %v22_v33 }
  0x30   :  { %239 = vmatprep.mubr.msk.f32.mxu0 %vm298_vm0, %v299_v6 }
  0x33   :  { %240 = vmatmul.mubr.f32.gmra.mrb[8].mxu0 %v18_v34 }
  0xf6   :  { %v112_v36 = vpop.f32.mrb[0].mxu0  ;;  %v137_v37 = vpop.f32.mrb[0].mxu1 }
  0xf7   :  { %v113_v38 = vadd.f32 %v169_v35, %v112_v36  ;;  %v229_v39 = vpop.f32.mrb[1].mxu0  ;;  %v138_v40 = vadd.f32 %v169_v35, %v137_v37  ;;  %v244_v41 = vpop.f32.mrb[1].mxu1 }
  0xf9   :  { %156 = vst [vmem:[%s446_s3] sm:$0xff] %v113_v38  ;;  %161 = vst [vmem:[%s446_s3 + $0x28] sm:$0xff] %v138_v40 }
  0xfa   :  { %v117_v42 = vpop.f32.mrb[2].mxu0  ;;  %v142_v43 = vpop.f32.mrb[2].mxu1 }
  0xfb   :  { %v118_v44 = vadd.f32 %v169_v35, %v117_v42  ;;  %v232_v45 = vpop.f32.mrb[3].mxu0  ;;  %v143_v46 = vadd.f32 %v169_v35, %v142_v43  ;;  %v247_v47 = vpop.f32.mrb[3].mxu1 }
  0xfd   :  { %157 = vst [vmem:[%s446_s3 + $0x8] sm:$0xff] %v118_v44  ;;  %162 = vst [vmem:[%s446_s3 + $0x30] sm:$0xff] %v143_v46 }
  0xfe   :  { %v122_v48 = vpop.f32.mrb[4].mxu0  ;;  %v147_v49 = vpop.f32.mrb[4].mxu1 }
  0xff   :  { %v123_v50 = vadd.f32 %v169_v35, %v122_v48  ;;  %v235_v51 = vpop.f32.mrb[5].mxu0  ;;  %v148_v52 = vadd.f32 %v169_v35, %v147_v49  ;;  %v250_v53 = vpop.f32.mrb[5].mxu1 }
 0x101   :  { %158 = vst [vmem:[%s446_s3 + $0x10] sm:$0xff] %v123_v50  ;;  %163 = vst [vmem:[%s446_s3 + $0x38] sm:$0xff] %v148_v52 }
 0x102   :  { %v127_v54 = vpop.f32.mrb[6].mxu0  ;;  %v152_v55 = vpop.f32.mrb[6].mxu1 }
 0x103   :  { %v128_v56 = vadd.f32 %v169_v35, %v127_v54  ;;  %v238_v57 = vpop.f32.mrb[7].mxu0  ;;  %v153_v58 = vadd.f32 %v169_v35, %v152_v55  ;;  %v253_v59 = vpop.f32.mrb[7].mxu1 }
 0x105   :  { %159 = vst [vmem:[%s446_s3 + $0x18] sm:$0xff] %v128_v56  ;;  %164 = vst [vmem:[%s446_s3 + $0x40] sm:$0xff] %v153_v58 }
 0x106   :  { %v132_v60 = vpop.f32.mrb[8].mxu0 }
 0x107   :  { %v133_v61 = vadd.f32 %v169_v35, %v132_v60  ;;  %v241_v62 = vpop.f32.mrb[9].mxu0 }
 0x109   :  { %160 = vst [vmem:[%s446_s3 + $0x20] sm:$0xff] %v133_v61 }

</bundles_post_ra>
